<compile_context>
chip_gen: v7x
topology: tpu7x:2x2x1
jax: 0.10.0
libtpu: 0.0.40
codegen_flags: <defaults>
</compile_context>

<pallas_src>
import jax
import jax.numpy as jnp
from jax.experimental import pallas as pl
from jax.experimental.pallas import tpu as pltpu

NUM_L1 = 20        # hidden units (num_l1 in the torch script)
NUM_CLASSES = 2    # len(digits) = len((4, 9))

_LANE = 128
_NEG_LARGE = -1e30  # bias for padded class columns -> exp underflows to 0

H_PAD = ((NUM_L1 + _LANE - 1) // _LANE) * _LANE       # 128
C_PAD = ((NUM_CLASSES + _LANE - 1) // _LANE) * _LANE  # 128


def _round_up(x, m):
    return (x + m - 1) // m * m


def _cdiv(a, b):
    return -(-a // b)


def _choose_batch_tile(B, tile_b, min_steps=2):
    """Batch tile (multiple of 8) that minimizes padding waste and, when the
    batch allows, keeps >= min_steps grid steps (v7x megacore sharding)."""
    steps_by_tile = _cdiv(B, tile_b)
    max_steps = _cdiv(B, 8)
    steps = max(steps_by_tile, min(min_steps, max_steps))
    return _round_up(_cdiv(B, steps), 8)


def _mlp_softmax_kernel(x_ref, w1_ref, b1_ref, w2_ref, b2_ref, o_ref):
    # ---- layer 1: relu(x @ W1 + b1); cast x -> bf16 on-chip, f32 MXU acc ----
    x = x_ref[...].astype(w1_ref.dtype)
    h = jnp.dot(x, w1_ref[...], preferred_element_type=jnp.float32) + b1_ref[...]
    h = jnp.maximum(h, 0.0)

    # ---- layer 2: logits = h @ W2 + b2 (padded class cols carry -1e30 bias) ----
    logits = jnp.dot(h.astype(w2_ref.dtype), w2_ref[...],
                     preferred_element_type=jnp.float32) + b2_ref[...]

    # ---- numerically stable softmax over the 128-lane class slab ----
    m = jnp.max(logits, axis=-1, keepdims=True)
    e = jnp.exp(logits - m)                       # padded cols: exp(-huge) == 0
    denom = jnp.sum(e, axis=-1, keepdims=True)
    probs = e / denom                             # exact normalization

    # Store only the real class columns (narrow, contiguous HBM output).
    o_ref[...] = probs[:, :o_ref.shape[-1]].astype(o_ref.dtype)


def prepare_params(w1, b1, w2, b2, matmul_dtype=jnp.bfloat16):
    """One-time padding/cast of the (tiny) weights & biases."""
    F, H = w1.shape
    Hw, C = w2.shape
    assert Hw == H
    w1p = jnp.zeros((F, H_PAD), matmul_dtype).at[:, :H].set(
        w1.astype(matmul_dtype))
    b1p = jnp.zeros((1, H_PAD), jnp.float32).at[:, :H].set(
        b1.reshape(1, H).astype(jnp.float32))
    w2p = jnp.zeros((H_PAD, C_PAD), matmul_dtype).at[:H, :C].set(
        w2.astype(matmul_dtype))
    b2p = jnp.full((1, C_PAD), _NEG_LARGE, jnp.float32).at[:, :C].set(
        b2.reshape(1, C).astype(jnp.float32))
    return (w1p, b1p, w2p, b2p)


def net_forward(x, params, *, tile_b=1024):
    """Pallas equivalent of Net.forward.

    x      : [B, F] float32 (unpadded; only the batch axis is padded if needed)
    params : output of prepare_params(w1, b1, w2, b2)
    """
    w1p, b1p, w2p, b2p = params
    B, F = x.shape
    assert w1p.shape[0] == F
    C = NUM_CLASSES

    TB = _choose_batch_tile(B, tile_b)
    B_pad = _round_up(B, TB)
    xp = x if B_pad == B else jnp.pad(x, ((0, B_pad - B), (0, 0)))

    # Double-buffered VMEM footprint (x tile, output tile, resident weights)
    # plus margin for the [TB, 128] f32 intermediates.
    vmem_bytes = (2 * (TB * F * 4 + TB * C * 4)
                  + 2 * (F * H_PAD * 2 + H_PAD * C_PAD * 2 + 2 * C_PAD * 4)
                  + 6 * TB * H_PAD * 4)
    vmem_limit = int(min(max(vmem_bytes + (4 << 20), 32 << 20), 64 << 20))

    grid = (B_pad // TB,)
    out = pl.pallas_call(
        _mlp_softmax_kernel,
        out_shape=jax.ShapeDtypeStruct((B_pad, C), jnp.float32),
        grid=grid,
        in_specs=[
            pl.BlockSpec((TB, F), lambda i: (i, 0)),       # x: tiled over batch
            pl.BlockSpec((F, H_PAD), lambda i: (0, 0)),    # w1: resident
            pl.BlockSpec((1, H_PAD), lambda i: (0, 0)),    # b1: resident
            pl.BlockSpec((H_PAD, C_PAD), lambda i: (0, 0)),  # w2: resident
            pl.BlockSpec((1, C_PAD), lambda i: (0, 0)),    # b2: resident
        ],
        out_specs=pl.BlockSpec((TB, C), lambda i: (i, 0)),
        compiler_params=pltpu.CompilerParams(
            dimension_semantics=("parallel",),
            vmem_limit_bytes=vmem_limit),
    )(xp, w1p, b1p, w2p, b2p)

    return out if B_pad == B else out[:B]


def _reference_f32(x, w1, b1, w2, b2):
    h = jnp.maximum(x @ w1 + b1.reshape(1, -1), 0.0)
    logits = h @ w2 + b2.reshape(1, -1)
    return jax.nn.softmax(logits, axis=1)


def _reference_cast(x, w1, b1, w2, b2, dtype):
    # Reference with the same bf16 operand casts as the kernel (f32 accumulate).
    h = jnp.dot(x.astype(dtype), w1.astype(dtype),
                preferred_element_type=jnp.float32) + b1.reshape(1, -1)
    h = jnp.maximum(h, 0.0)
    logits = jnp.dot(h.astype(dtype), w2.astype(dtype),
                     preferred_element_type=jnp.float32) + b2.reshape(1, -1)
    return jax.nn.softmax(logits, axis=1)


if __name__ == "__main__":
    key = jax.random.PRNGKey(0)
    k_x, k_w1, k_b1, k_w2, k_b2 = jax.random.split(key, 5)

    B = 8      # small batch
    F = 64     # num_features (small stand-in for 784 flattened MNIST pixels)

    x = jax.random.normal(k_x, (B, F), dtype=jnp.float32)

    # Deterministic parameter init (uniform like torch's default Linear init).
    bound1 = 1.0 / jnp.sqrt(F)
    w1 = jax.random.uniform(k_w1, (F, NUM_L1), minval=-bound1, maxval=bound1,
                            dtype=jnp.float32)
    b1 = jax.random.uniform(k_b1, (1, NUM_L1), minval=-bound1, maxval=bound1,
                            dtype=jnp.float32)
    bound2 = 1.0 / jnp.sqrt(NUM_L1)
    w2 = jax.random.uniform(k_w2, (NUM_L1, NUM_CLASSES), minval=-bound2,
                            maxval=bound2, dtype=jnp.float32)
    b2 = jax.random.uniform(k_b2, (1, NUM_CLASSES), minval=-bound2,
                            maxval=bound2, dtype=jnp.float32)

    # One-time parameter prep (padding + bf16 cast hoisted out of the forward).
    params = prepare_params(w1, b1, w2, b2)

    out = net_forward(x, params)
    out = jax.block_until_ready(out)
    assert out.shape == (B, NUM_CLASSES)

    # Tight check vs. a reference with the same bf16 operand casts.
    ref_cast = _reference_cast(x, w1, b1, w2, b2, jnp.bfloat16)
    assert jnp.allclose(out, ref_cast, atol=2e-3, rtol=2e-3)

    # Looser check vs. the pure f32 torch-equivalent forward.
    ref_f32 = _reference_f32(x, w1, b1, w2, b2)
    assert jnp.allclose(out, ref_f32, atol=3e-2, rtol=3e-2)

    # Probabilities sum to 1 (exact divide in the kernel).
    assert jnp.allclose(jnp.sum(out, axis=1), 1.0, atol=1e-5)

    print("KERNEL_OK")
</pallas_src>

<mosaic_0001>
module attributes {stable_mosaic.version = 11 : i64} {
  func.func @_mlp_softmax_kernel(%arg0: i32, %arg1: memref<8x64xf32, #tpu.memory_space<vmem>>, %arg2: memref<64x128xbf16, #tpu.memory_space<vmem>>, %arg3: memref<1x128xf32, #tpu.memory_space<vmem>>, %arg4: memref<128x128xbf16, #tpu.memory_space<vmem>>, %arg5: memref<1x128xf32, #tpu.memory_space<vmem>>, %arg6: memref<8x2xf32, #tpu.memory_space<vmem>>) attributes {dimension_semantics = [#tpu.dimension_semantics<parallel>], iteration_bounds = array<i64: 1>, scalar_prefetch = 0 : i64, scratch_operands = 0 : i64, tpu.core_type = #tpu.core_type<tc>, window_params = [{transform_indices = @transform_0, window_bounds = array<i64: 8, 64>}, {pipeline_mode = #tpu.pipeline_mode<synchronous>, transform_indices = @transform_1, window_bounds = array<i64: 64, 128>}, {pipeline_mode = #tpu.pipeline_mode<synchronous>, transform_indices = @transform_2, window_bounds = array<i64: 1, 128>}, {pipeline_mode = #tpu.pipeline_mode<synchronous>, transform_indices = @transform_3, window_bounds = array<i64: 128, 128>}, {pipeline_mode = #tpu.pipeline_mode<synchronous>, transform_indices = @transform_4, window_bounds = array<i64: 1, 128>}, {transform_indices = @transform_5, window_bounds = array<i64: 8, 2>}]} {
    %c0 = arith.constant 0 : index
    %c0_0 = arith.constant 0 : index
    %0 = vector.load %arg1[%c0, %c0_0] : memref<8x64xf32, #tpu.memory_space<vmem>>, vector<8x64xf32>
    %1 = arith.truncf %0 : vector<8x64xf32> to vector<8x64xbf16>
    %c0_1 = arith.constant 0 : index
    %c0_2 = arith.constant 0 : index
    %2 = vector.load %arg2[%c0_1, %c0_2] : memref<64x128xbf16, #tpu.memory_space<vmem>>, vector<64x128xbf16>
    %cst = arith.constant dense<0.000000e+00> : vector<8x128xf32>
    %3 = tpu.matmul %1, %2, %cst {dimension_numbers = #tpu.dot_dimension_numbers<[1], [0], [0], [1], [0, 0, 1, 1], [], []>} : vector<8x64xbf16>, vector<64x128xbf16>, vector<8x128xf32> -> vector<8x128xf32>
    %c0_3 = arith.constant 0 : index
    %c0_4 = arith.constant 0 : index
    %4 = vector.load %arg3[%c0_3, %c0_4] : memref<1x128xf32, #tpu.memory_space<vmem>>, vector<1x128xf32>
    %5 = vector.broadcast %4 : vector<1x128xf32> to vector<8x128xf32>
    %6 = arith.addf %3, %5 : vector<8x128xf32>
    %cst_5 = arith.constant 0.000000e+00 : f32
    %7 = vector.broadcast %cst_5 : f32 to vector<8x128xf32>
    %8 = arith.maximumf %6, %7 : vector<8x128xf32>
    %9 = arith.truncf %8 : vector<8x128xf32> to vector<8x128xbf16>
    %c0_6 = arith.constant 0 : index
    %c0_7 = arith.constant 0 : index
    %10 = vector.load %arg4[%c0_6, %c0_7] : memref<128x128xbf16, #tpu.memory_space<vmem>>, vector<128x128xbf16>
    %cst_8 = arith.constant dense<0.000000e+00> : vector<8x128xf32>
    %11 = tpu.matmul %9, %10, %cst_8 {dimension_numbers = #tpu.dot_dimension_numbers<[1], [0], [0], [1], [0, 0, 1, 1], [], []>} : vector<8x128xbf16>, vector<128x128xbf16>, vector<8x128xf32> -> vector<8x128xf32>
    %c0_9 = arith.constant 0 : index
    %c0_10 = arith.constant 0 : index
    %12 = vector.load %arg5[%c0_9, %c0_10] : memref<1x128xf32, #tpu.memory_space<vmem>>, vector<1x128xf32>
    %13 = vector.broadcast %12 : vector<1x128xf32> to vector<8x128xf32>
    %14 = arith.addf %11, %13 : vector<8x128xf32>
    %cst_11 = arith.constant dense<0xFF800000> : vector<8xf32>
    %15 = vector.multi_reduction <maximumf>, %14, %cst_11 [1] : vector<8x128xf32> to vector<8xf32>
    %16 = vector.shape_cast %15 : vector<8xf32> to vector<8x1xf32>
    %17 = vector.broadcast %16 : vector<8x1xf32> to vector<8x128xf32>
    %18 = arith.subf %14, %17 : vector<8x128xf32>
    %19 = math.exp %18 : vector<8x128xf32>
    %cst_12 = arith.constant dense<0.000000e+00> : vector<8xf32>
    %20 = vector.multi_reduction <add>, %19, %cst_12 [1] : vector<8x128xf32> to vector<8xf32>
    %21 = vector.shape_cast %20 : vector<8xf32> to vector<8x1xf32>
    %22 = vector.broadcast %21 : vector<8x1xf32> to vector<8x128xf32>
    %23 = arith.divf %19, %22 : vector<8x128xf32>
    %24 = vector.extract_strided_slice %23 {offsets = [0, 0], sizes = [8, 2], strides = [1, 1]} : vector<8x128xf32> to vector<8x2xf32>
    %c0_13 = arith.constant 0 : index
    %c0_14 = arith.constant 0 : index
    %25 = vector.load %arg6[%c0_13, %c0_14] : memref<8x2xf32, #tpu.memory_space<vmem>>, vector<8x2xf32>
    tpu.vector_store %arg6[%c0_13, %c0_14], %24 {strides = array<i32>} : memref<8x2xf32, #tpu.memory_space<vmem>>, vector<8x2xf32>,
    return
  }
  func.func @transform_0(%arg0: i32) -> (i32, i32) {
    %c0_i32 = arith.constant 0 : i32
    %c0_i32_0 = arith.constant 0 : i32
    return %arg0, %c0_i32 : i32, i32
  }
  func.func @transform_1(%arg0: i32) -> (i32, i32) {
    %c0_i32 = arith.constant 0 : i32
    %c0_i32_0 = arith.constant 0 : i32
    %c0_i32_1 = arith.constant 0 : i32
    return %c0_i32, %c0_i32_0 : i32, i32
  }
  func.func @transform_2(%arg0: i32) -> (i32, i32) {
    %c0_i32 = arith.constant 0 : i32
    %c0_i32_0 = arith.constant 0 : i32
    %c0_i32_1 = arith.constant 0 : i32
    return %c0_i32, %c0_i32_0 : i32, i32
  }
  func.func @transform_3(%arg0: i32) -> (i32, i32) {
    %c0_i32 = arith.constant 0 : i32
    %c0_i32_0 = arith.constant 0 : i32
    %c0_i32_1 = arith.constant 0 : i32
    return %c0_i32, %c0_i32_0 : i32, i32
  }
  func.func @transform_4(%arg0: i32) -> (i32, i32) {
    %c0_i32 = arith.constant 0 : i32
    %c0_i32_0 = arith.constant 0 : i32
    %c0_i32_1 = arith.constant 0 : i32
    return %c0_i32, %c0_i32_0 : i32, i32
  }
  func.func @transform_5(%arg0: i32) -> (i32, i32) {
    %c0_i32 = arith.constant 0 : i32
    %c0_i32_0 = arith.constant 0 : i32
    return %arg0, %c0_i32 : i32, i32
  }
}

</mosaic_0001>

<bundles_post_ra>
// kernel: tpu_custom_call.1
= control target key start
LH: loop header
LB: loop body
LE: loop exit
PB: predicated region body
PF: predicated region fallthrough
CT: control target
= control target key end

     0   :  { %10 = vsyncpa [#allocation3], 0  ;;  %s517_s0 = inlined_call_operand.hbm [shape: f32[8,64], index: 0, kind: input, shape index: {}]   ;;  %s518_s1 = inlined_call_operand.hbm [shape: bf16[64,128], index: 1, kind: input, shape index: {}]   ;;  %s519_s2 = inlined_call_operand.vmem [shape: f32[1,128], index: 2, kind: input, shape index: {}]   ;;  %s520_s3 = inlined_call_operand.hbm [shape: bf16[128,128], index: 3, kind: input, shape index: {}]   ;;  %s521_s4 = inlined_call_operand.vmem [shape: f32[1,128], index: 4, kind: input, shape index: {}]   ;;  %s522_s5 = inlined_call_operand.vmem [shape: f32[8,2], index: 5, kind: output, shape index: {}]  }
   0x1   :  { %11 = vsyncpa [#allocation5], 0  ;;  %s429_s18 = smov [#allocation4]   ;;  %s359_s22 = scalar_lea.hbm %s518_s1, 512 }
   0x2   :  { %s27_s19 = sshll.u32 %s429_s18, 4  ;;  %p360_p0 = scmp.ne.s32.totalorder %s518_s1, %s359_s22  ;;  %s28_s19 = int_to_ptr.vmem [resolvable:$true] %s27_s19 }
   0x3   :  { %p363_p1 = scmp.lt.u32.totalorder %s359_s22, %s518_s1 }
   0x5   :  { %p365_p2 = pnand %p363_p1, %p360_p0 }
   0x7   :  { %368 = shalt.err (!%p365_p2)
}
   0x8   :  { %s369_s27 = scalar_lea.vmem %s28_s19, 512  ;;  %p374_p4 = scmp.lt.s32.totalorder %s28_s19, %s28_s19 }
   0x9   :  { %p370_p3 = scmp.ne.s32.totalorder %s28_s19, %s369_s27  ;;  %p375_p5 = scmp.lt.s32.totalorder %s369_s27, %s369_s27 }
   0xb   :  { %p376_p6 = por %p375_p5, %p374_p4 }
   0xd   :  { %p377_p7 = pnand %p376_p6, %p370_p3 }
   0xf   :  { %380 = shalt.err (!%p377_p7)
}
  0x10   :  { %s430_s28 = smov 64   ;;  %s431_s29 = smov 4  }
  0x11   :  { %33 = dma.hbm_to_vmem [thread:$0]  %s518_s1, 512, %s28_s19, [#allocation5], %s430_s28, %s430_s28, %s431_s29  }
  0x12   :  { %s432_s7 = smov [#allocation2]   ;;  %s433_s9 = smov [#allocation6]  }
  0x13   :  { %s18_s8 = sshll.u32 %s432_s7, 4  ;;  %s41_s10 = sshll.u32 %s433_s9, 4  ;;  %s19_s8 = int_to_ptr.vmem [resolvable:$true] %s18_s8  ;;  %s42_s10 = int_to_ptr.vmem [resolvable:$true] %s41_s10 }
  0x14   :  { %s381_s13 = scalar_lea.hbm %s517_s0, 128 }
  0x15   :  { %p382_p8 = scmp.ne.s32.totalorder %s517_s0, %s381_s13  ;;  %p385_p9 = scmp.lt.u32.totalorder %s381_s13, %s517_s0 }
  0x17   :  { %p387_p10 = pnand %p385_p9, %p382_p8 }
  0x19   :  { %390 = shalt.err (!%p387_p10)
}
  0x1a   :  { %s391_s1 = scalar_lea.vmem %s19_s8, 128  ;;  %p396_p12 = scmp.lt.s32.totalorder %s19_s8, %s19_s8 }
  0x1b   :  { %p392_p11 = scmp.ne.s32.totalorder %s19_s8, %s391_s1  ;;  %p397_p13 = scmp.lt.s32.totalorder %s391_s1, %s391_s1 }
  0x1d   :  { %p398_p0 = por %p397_p13, %p396_p12 }
  0x1f   :  { %p399_p1 = pnand %p398_p0, %p392_p11 }
  0x21   :  { %402 = shalt.err (!%p399_p1)
}
  0x22   :  { %21 = dma.hbm_to_vmem [thread:$0]  %s517_s0, 128, %s19_s8, [#allocation3]  }
  0x23   :  { %s403_s22 = scalar_lea.hbm %s520_s3, 1024 }
  0x24   :  { %p404_p2 = scmp.ne.s32.totalorder %s520_s3, %s403_s22  ;;  %p407_p3 = scmp.lt.u32.totalorder %s403_s22, %s520_s3 }
  0x26   :  { %p409_p4 = pnand %p407_p3, %p404_p2 }
  0x28   :  { %412 = shalt.err (!%p409_p4)
}
  0x29   :  { %s413_s27 = scalar_lea.vmem %s42_s10, 1024  ;;  %p418_p6 = scmp.lt.s32.totalorder %s42_s10, %s42_s10 }
  0x2a   :  { %p414_p5 = scmp.ne.s32.totalorder %s42_s10, %s413_s27  ;;  %p419_p7 = scmp.lt.s32.totalorder %s413_s27, %s413_s27 }
  0x2c   :  { %p420_p8 = por %p419_p7, %p418_p6 }
  0x2e   :  { %p421_p9 = pnand %p420_p8, %p414_p5 }
  0x30   :  { %424 = shalt.err (!%p421_p9)
}
  0x31   :  { %47 = dma.hbm_to_vmem [thread:$0]  %s520_s3, 1024, %s42_s10, [#allocation5], %s430_s28, %s430_s28, %s431_s29  }
  0x32   :  { %425 = dma.done.wait [#allocation3], 128  }
  0x33   :  { %426 = vsyncadd [#allocation3], 4294967168 }
  0x34   :  { %427 = dma.done.wait [#allocation5], 1536  }
  0x35   :  { %428 = vsyncadd [#allocation5], 4294965760  ;;  %v434_v0 = vmov 0.0   ;;  %vm435_vm0 = vmmov 0   ;;  %v343_v1 = vld [vmem:[#allocation4] sm:$0xff]   ;;  %v344_v2 = vld [vmem:[#allocation4 + $0x8] sm:$0xff]  }
  0x36   :  { %304 = vmatprep.subr.bf16.mxu0 %v434_v0  ;;  %312 = vmatprep.mubr.msk.bf16.mxu0 %vm435_vm0, %v434_v0  ;;  %v347_v3 = vld [vmem:[#allocation6] sm:$0xff]   ;;  %v345_v4 = vld [vmem:[#allocation4 + $0x10] sm:$0xff]   ;;  %v348_v5 = vld [vmem:[#allocation6 + $0x8] sm:$0xff]   ;;  %vm101_vm1 = vcmask 523264   ;;  %vm267_vm2 = vcmask 15360  }
  0x37   :  { %316 = vmatprep.subr.bf16.mxu1 %v434_v0  ;;  %332 = vmatprep.mubr.msk.bf16.mxu1 %vm435_vm0, %v434_v0  ;;  %v346_v6 = vld [vmem:[#allocation4 + $0x18] sm:$0xff]   ;;  %v349_v8 = vld [vmem:[#allocation6 + $0x10] sm:$0xff]   ;;  %v351_v11 = vld [vmem:[#allocation6 + $0x20] sm:$0xff]  }
  0x38   :  { %305 = vmatpush3.bf16.msra.mxu0 %v343_v1  ;;  %317 = vmatpush3.bf16.msra.mxu1 %v347_v3  ;;  %v60_v7 = vld [vmem:[#allocation2] sm:$0xff]  ;;  %v352_v12 = vld [vmem:[#allocation6 + $0x28] sm:$0xff]   ;;  %v353_v13 = vld [vmem:[#allocation6 + $0x30] sm:$0xff]  }
  0x39   :  { %306 = vmatprep.subr.bf16.mxu0 %v434_v0  ;;  %318 = vmatprep.subr.bf16.mxu1 %v434_v0  ;;  %v61_v9 = vpack.c.bf16 %v60_v7, %v60_v7  ;;  %v350_v10 = vld [vmem:[#allocation6 + $0x18] sm:$0xff]  }
  0x3a   :  { %v354_v14 = vld [vmem:[#allocation6 + $0x38] sm:$0xff]  }
  0x3b   :  { %v275_v15 = vld [vmem:[%s519_s2] ss:$0 sm:$0xff] }
  0x3c   :  { %307 = vmatpush3.bf16.msra.mxu0 %v344_v2  ;;  %319 = vmatpush3.bf16.msra.mxu1 %v348_v5  ;;  %v281_v23 = vld [vmem:[%s521_s4] ss:$0 sm:$0xff] }
  0x3d   :  { %308 = vmatprep.subr.bf16.mxu0 %v434_v0  ;;  %320 = vmatprep.subr.bf16.mxu1 %v434_v0 }
  0x40   :  { %309 = vmatpush3.bf16.msra.mxu0 %v345_v4  ;;  %321 = vmatpush3.bf16.msra.mxu1 %v349_v8 }
  0x41   :  { %310 = vmatprep.subr.bf16.mxu0 %v434_v0  ;;  %322 = vmatprep.subr.bf16.mxu1 %v434_v0 }
  0x44   :  { %311 = vmatpush3.bf16.msra.mxu0 %v346_v6  ;;  %323 = vmatpush3.bf16.msra.mxu1 %v350_v10 }
  0x45   :  { %324 = vmatprep.subr.bf16.mxu1 %v434_v0 }
  0x47   :  { %313 = vmatmul.mubr.msk.bf16.vlgmr.msra.gmra.mrb[0].mxu0 %vm101_vm1, %v61_v9 }
  0x48   :  { %325 = vmatpush3.bf16.msra.mxu1 %v351_v11 }
  0x49   :  { %326 = vmatprep.subr.bf16.mxu1 %v434_v0 }
  0x4c   :  { %327 = vmatpush3.bf16.msra.mxu1 %v352_v12 }
  0x4d   :  { %328 = vmatprep.subr.bf16.mxu1 %v434_v0 }
  0x50   :  { %329 = vmatpush3.bf16.msra.mxu1 %v353_v13 }
  0x51   :  { %330 = vmatprep.subr.bf16.mxu1 %v434_v0 }
  0x54   :  { %331 = vmatpush3.bf16.msra.mxu1 %v354_v14 }
 0x11a   :  { %v139_v16 = vpop.f32.mrb[0].mxu0 }
 0x11b   :  { %v140_v17 = vadd.f32 %v275_v15, %v139_v16  ;;  %v314_v18 = vpop.f32.mrb[1].mxu0 }
 0x11c   :  { %v142_v19 = vpop.f32.mrb[2].mxu0 }
 0x11d   :  { %v145_v20 = vmax.f32 %v140_v17, 0.0  ;;  %v315_v21 = vpop.f32.mrb[3].mxu0 }
 0x11f   :  { %v146_v22 = vpack.c.bf16 %v145_v20, %v145_v20 }
 0x121   :  { %333 = vmatmul.mubr.bf16.vlgmr.msra.gmra.mrb[0].mxu1 %v146_v22 }
 0x1f4   :  { %v252_v24 = vpop.f32.mrb[0].mxu1 }
 0x1f5   :  { %v253_v25 = vadd.f32 %v281_v23, %v252_v24  ;;  %v334_v26 = vpop.f32.mrb[1].mxu1 }
 0x1f6   :  { %v255_v27 = vpop.f32.mrb[2].mxu1 }
 0x1f7   :  { %258 = vmax.xlane.f32.xlu0 %v253_v25  ;;  %v335_v28 = vpop.f32.mrb[3].mxu1 }
 0x284   :  { %v259_v29 = vpop.xlane.xlu0 %258 }
 0x285   :  { %v260_v30 = vsub.f32 %v253_v25, %v259_v29 }
 0x287   :  { %v261_v31 = vmul.f32 1.442695, %v260_v30 }
 0x289   :  { %355 = vpow2.f32 %v261_v31 }
 0x293   :  { %v356_v32 = vpop.eup %355 }
 0x294   :  { %263 = vadd.xlane.f32.xlu0 %v356_v32 }
 0x321   :  { %v264_v33 = vpop.xlane.xlu0 %263 }
 0x322   :  { %357 = vrcp.f32 %v264_v33 }
 0x32c   :  { %v358_v34 = vpop.eup %357 }
 0x32d   :  { %v266_v35 = vmul.f32 %v358_v34, %v356_v32 }
 0x32f   :  { %268 = vst.msk [vmem:[%s522_s5] sm:$0xff] %vm267_vm2, %v266_v35 }
 0x330   :  { %273 = vsyncpa [#allocation3], 1 }
 0x331   :  { %274 = vsyncpa [#allocation5], 1 }

</bundles_post_ra>
